<compile_context>
chip_gen: v7x
topology: tpu7x:2x2x1
jax: 0.10.0
libtpu: 0.0.40
codegen_flags: <defaults>
</compile_context>

<pallas_src>
import jax
import jax.numpy as jnp
from jax import lax
from jax.experimental import pallas as pl
from jax.experimental.pallas import tpu as pltpu


def lstm_kernel(x_ref, wx_ref, wh_ref, b_ref, c_ref, h_ref, xp_ref):
    """One grid step = one chunk of Tc timesteps (all B sequences).

    x_ref : (Tc*B, in_dim)   chunk of inputs, rows ordered (t, b) step-major
    wx_ref: (in_dim, 4H)     input->gates weight (transposed nn.Linear)
    wh_ref: (H, 4H)          hidden->gates weight (transposed nn.Linear)
    b_ref : (1, 4H)          fused bias (bx + bh), f32
    c_ref : (B, H)           cell state  (output block, resident across grid)
    h_ref : (B, H)           hidden state (output block, resident across grid)
    xp_ref: (Tc*B, 4H) f32   scratch: hoisted input projection for this chunk
    """
    B, H = c_ref.shape
    Tc = x_ref.shape[0] // B

    # Zero-initialize the carried state on the first chunk only.
    @pl.when(pl.program_id(0) == 0)
    def _():
        c_ref[...] = jnp.zeros_like(c_ref)
        h_ref[...] = jnp.zeros_like(h_ref)

    # Hoisted (non-recurrent) projection: one batched MXU matmul per chunk.
    #   (Tc*B, 4H) = X_chunk @ Wx^T + (bx + bh), accumulated in f32.
    xp_ref[...] = (
        jnp.dot(x_ref[...], wx_ref[...], preferred_element_type=jnp.float32)
        + b_ref[...]
    )

    def step(t, carry):
        c_prev, h_prev = carry
        start = t * B
        if B % 8 == 0:  # sublane-aligned rows -> cheaper dynamic slice
            start = pl.multiple_of(start, 8)
        # Per-step critical path: one (B,H)x(H,4H) matmul + precomputed rows.
        # Wh is read from its ref here (not hoisted) to keep vreg pressure low.
        iofu = xp_ref[pl.ds(start, B), :] + jnp.dot(
            h_prev.astype(wh_ref.dtype), wh_ref[...],
            preferred_element_type=jnp.float32)

        # NOTE: with H < 128 these slices are not lane-aligned (fine at test
        # size; require H % 128 == 0 in production).
        i_g = jax.nn.sigmoid(iofu[:, 0 * H:1 * H])
        o_g = jax.nn.sigmoid(iofu[:, 1 * H:2 * H])
        f_g = jax.nn.sigmoid(iofu[:, 2 * H:3 * H])
        u_g = jnp.tanh(iofu[:, 3 * H:4 * H])

        c_new = i_g * u_g + f_g * c_prev
        h_new = o_g * jnp.tanh(c_new)          # use_o=True path
        return (c_new, h_new)

    # Carry comes from / returns to the resident output blocks.
    c0 = c_ref[...]
    h0 = h_ref[...]
    c_f, h_f = lax.fori_loop(0, Tc, step, (c0, h0), unroll=min(Tc, 8))

    c_ref[...] = c_f
    h_ref[...] = h_f


def _pick_chunk_steps(T, B, max_rows=512):
    """Largest Tc dividing T with Tc*B sublane-aligned (mult. of 8) and small
    enough to keep the streamed chunk + projection scratch VMEM-bounded."""
    cands = [tc for tc in range(1, T + 1)
             if T % tc == 0 and (tc * B) % 8 == 0 and tc * B <= max(max_rows, B)]
    return max(cands) if cands else T


def _vmem_limit_bytes(rows, in_dim, four_h, H, B, compute_itemsize):
    x_stream = 2 * rows * in_dim * compute_itemsize            # double-buffered X chunks
    weights = 2 * (in_dim + H) * four_h * compute_itemsize      # Wx + Wh (worst case x2 bufs)
    bias = 2 * four_h * 4
    xp = rows * four_h * 4
    outs = 2 * B * H * 4
    est = x_stream + weights + bias + xp + outs
    # Explicit scoped-VMEM budget (default is 16/32 MiB on v5e/v6e).  Keep the
    # cap conservative; on v7x (64 MiB physical) shrink chunk_steps instead.
    return int(min(max(2 * est, 32 * 1024 * 1024), 100 * 1024 * 1024))


def lstm_forward(inputs, wx_t, wh_t, bx, bh, *,
                 compute_dtype=jnp.bfloat16, chunk_steps=None):
    """inputs: (T, B, in_dim); returns (c_t, h_t) each (B, mem_dim) float32.

    B=1 matches the PyTorch module's forward exactly (single sequence).
    compute_dtype controls the MXU operand dtype (bf16 recommended);
    accumulation and all gate math stay in float32.
    """
    T, B, in_dim = inputs.shape
    four_h = wx_t.shape[1]
    H = four_h // 4
    assert wh_t.shape == (H, four_h)

    Tc = _pick_chunk_steps(T, B) if chunk_steps is None else chunk_steps
    assert T % Tc == 0, "chunk_steps must divide the sequence length"
    rows = Tc * B

    x2d = inputs.reshape(T * B, in_dim).astype(compute_dtype)
    wx = wx_t.astype(compute_dtype)
    wh = wh_t.astype(compute_dtype)
    bias = (bx + bh).astype(jnp.float32)       # fuse the two biases on the host

    grid_spec = pltpu.PrefetchScalarGridSpec(
        num_scalar_prefetch=0,
        grid=(T // Tc,),                       # sequence chunks, serial ("arbitrary")
        in_specs=[
            pl.BlockSpec((rows, in_dim), lambda g: (g, 0)),     # streamed X chunk
            pl.BlockSpec((in_dim, four_h), lambda g: (0, 0)),   # Wx (loop-invariant)
            pl.BlockSpec((H, four_h), lambda g: (0, 0)),        # Wh (loop-invariant)
            pl.BlockSpec((1, four_h), lambda g: (0, 0)),        # fused bias
        ],
        out_specs=[
            pl.BlockSpec((B, H), lambda g: (0, 0)),             # c state (resident)
            pl.BlockSpec((B, H), lambda g: (0, 0)),             # h state (resident)
        ],
        scratch_shapes=[
            pltpu.VMEM((rows, four_h), jnp.float32),            # chunk input projection
        ],
    )

    compute_itemsize = jnp.dtype(compute_dtype).itemsize
    vmem_limit = _vmem_limit_bytes(rows, in_dim, four_h, H, B, compute_itemsize)

    c_t, h_t = pl.pallas_call(
        lstm_kernel,
        out_shape=(jax.ShapeDtypeStruct((B, H), jnp.float32),
                   jax.ShapeDtypeStruct((B, H), jnp.float32)),
        grid_spec=grid_spec,
        compiler_params=pltpu.CompilerParams(
            dimension_semantics=("arbitrary",),
            vmem_limit_bytes=vmem_limit),
    )(x2d, wx, wh, bias)
    return c_t, h_t


def lstm_reference(inputs, wx_t, wh_t, bx, bh):
    """Pure-JAX reference mirroring the PyTorch module (f32 everywhere)."""
    T, B, _ = inputs.shape
    H = wh_t.shape[0]
    c = jnp.zeros((B, H), jnp.float32)
    h = jnp.zeros((B, H), jnp.float32)
    for t in range(T):
        iofu = inputs[t] @ wx_t + bx + h @ wh_t + bh
        i, o, f, u = jnp.split(iofu, 4, axis=1)
        i, o, f, u = (jax.nn.sigmoid(i), jax.nn.sigmoid(o),
                      jax.nn.sigmoid(f), jnp.tanh(u))
        c = i * u + f * c
        h = o * jnp.tanh(c)
    return c, h


if __name__ == "__main__":
    in_dim, mem_dim, seq = 16, 32, 8

    key = jax.random.PRNGKey(0)
    k1, k2, k3, k4, k5, k6 = jax.random.split(key, 6)

    # Deterministic params, PyTorch-Linear-style uniform init scale.
    sx = 1.0 / (in_dim ** 0.5)
    sh = 1.0 / (mem_dim ** 0.5)
    wx_t = jax.random.uniform(k1, (in_dim, 4 * mem_dim), jnp.float32, -sx, sx)
    bx = jax.random.uniform(k2, (1, 4 * mem_dim), jnp.float32, -sx, sx)
    wh_t = jax.random.uniform(k3, (mem_dim, 4 * mem_dim), jnp.float32, -sh, sh)
    bh = jax.random.uniform(k4, (1, 4 * mem_dim), jnp.float32, -sh, sh)

    # --- 1) Module-exact path: single sequence (B=1), f32 MXU operands. ---
    inputs = jax.random.normal(k5, (seq, 1, in_dim), jnp.float32)
    c_t, h_t = lstm_forward(inputs, wx_t, wh_t, bx, bh,
                            compute_dtype=jnp.float32)
    jax.block_until_ready((c_t, h_t))

    c_ref, h_ref = lstm_reference(inputs, wx_t, wh_t, bx, bh)
    assert c_t.shape == (1, mem_dim) and h_t.shape == (1, mem_dim)
    assert jnp.allclose(c_t, c_ref, atol=1e-5, rtol=1e-5)
    assert jnp.allclose(h_t, h_ref, atol=1e-5, rtol=1e-5)

    # --- 2) Batched + bf16 MXU path with T-chunked streaming (grid=(4,)). ---
    B = 4
    inputs_b = jax.random.normal(k6, (seq, B, in_dim), jnp.float32)
    c_b, h_b = lstm_forward(inputs_b, wx_t, wh_t, bx, bh,
                            compute_dtype=jnp.bfloat16, chunk_steps=2)
    jax.block_until_ready((c_b, h_b))

    c_rb, h_rb = lstm_reference(inputs_b, wx_t, wh_t, bx, bh)
    assert c_b.shape == (B, mem_dim) and h_b.shape == (B, mem_dim)
    assert jnp.allclose(c_b, c_rb, atol=5e-2, rtol=5e-2)
    assert jnp.allclose(h_b, h_rb, atol=5e-2, rtol=5e-2)

    print("KERNEL_OK")
</pallas_src>

<mosaic_0001>
module attributes {stable_mosaic.version = 11 : i64} {
  func.func @lstm_kernel(%arg0: i32, %arg1: memref<8x16xf32, #tpu.memory_space<vmem>>, %arg2: memref<16x128xf32, #tpu.memory_space<vmem>>, %arg3: memref<32x128xf32, #tpu.memory_space<vmem>>, %arg4: memref<1x128xf32, #tpu.memory_space<vmem>>, %arg5: memref<1x32xf32, #tpu.memory_space<vmem>>, %arg6: memref<1x32xf32, #tpu.memory_space<vmem>>, %arg7: memref<8x128xf32, #tpu.memory_space<vmem>>) attributes {dimension_semantics = [#tpu.dimension_semantics<arbitrary>], iteration_bounds = array<i64: 1>, scalar_prefetch = 0 : i64, scratch_operands = 1 : i64, tpu.core_type = #tpu.core_type<tc>, window_params = [{transform_indices = @transform_0, window_bounds = array<i64: 8, 16>}, {pipeline_mode = #tpu.pipeline_mode<synchronous>, transform_indices = @transform_1, window_bounds = array<i64: 16, 128>}, {pipeline_mode = #tpu.pipeline_mode<synchronous>, transform_indices = @transform_2, window_bounds = array<i64: 32, 128>}, {pipeline_mode = #tpu.pipeline_mode<synchronous>, transform_indices = @transform_3, window_bounds = array<i64: 1, 128>}, {pipeline_mode = #tpu.pipeline_mode<synchronous>, transform_indices = @transform_4, window_bounds = array<i64: 1, 32>}, {pipeline_mode = #tpu.pipeline_mode<synchronous>, transform_indices = @transform_5, window_bounds = array<i64: 1, 32>}]} {
    %c0_i32 = arith.constant 0 : i32
    %0 = arith.cmpi eq, %arg0, %c0_i32 : i32
    %1 = arith.extui %0 : i1 to i32
    %c0_i32_0 = arith.constant 0 : i32
    %2 = arith.cmpi ne, %1, %c0_i32_0 : i32
    scf.if %2 {
      %cst_81 = arith.constant 0.000000e+00 : f32
      %262 = vector.broadcast %cst_81 : f32 to vector<1x32xf32>
      %c0_82 = arith.constant 0 : index
      %c0_83 = arith.constant 0 : index
      %263 = vector.load %arg5[%c0_82, %c0_83] : memref<1x32xf32, #tpu.memory_space<vmem>>, vector<1x32xf32>
      tpu.vector_store %arg5[%c0_82, %c0_83], %262 {strides = array<i32>} : memref<1x32xf32, #tpu.memory_space<vmem>>, vector<1x32xf32>,
      %cst_84 = arith.constant 0.000000e+00 : f32
      %264 = vector.broadcast %cst_84 : f32 to vector<1x32xf32>
      %c0_85 = arith.constant 0 : index
      %c0_86 = arith.constant 0 : index
      %265 = vector.load %arg6[%c0_85, %c0_86] : memref<1x32xf32, #tpu.memory_space<vmem>>, vector<1x32xf32>
      tpu.vector_store %arg6[%c0_85, %c0_86], %264 {strides = array<i32>} : memref<1x32xf32, #tpu.memory_space<vmem>>, vector<1x32xf32>,
    } else {
    }
    %c0 = arith.constant 0 : index
    %c0_1 = arith.constant 0 : index
    %3 = vector.load %arg1[%c0, %c0_1] : memref<8x16xf32, #tpu.memory_space<vmem>>, vector<8x16xf32>
    %c0_2 = arith.constant 0 : index
    %c0_3 = arith.constant 0 : index
    %4 = vector.load %arg2[%c0_2, %c0_3] : memref<16x128xf32, #tpu.memory_space<vmem>>, vector<16x128xf32>
    %cst = arith.constant dense<0.000000e+00> : vector<8x128xf32>
    %5 = tpu.matmul %3, %4, %cst {dimension_numbers = #tpu.dot_dimension_numbers<[1], [0], [0], [1], [0, 0, 1, 1], [], []>} : vector<8x16xf32>, vector<16x128xf32>, vector<8x128xf32> -> vector<8x128xf32>
    %c0_4 = arith.constant 0 : index
    %c0_5 = arith.constant 0 : index
    %6 = vector.load %arg4[%c0_4, %c0_5] : memref<1x128xf32, #tpu.memory_space<vmem>>, vector<1x128xf32>
    %7 = vector.broadcast %6 : vector<1x128xf32> to vector<8x128xf32>
    %8 = arith.addf %5, %7 : vector<8x128xf32>
    %c0_6 = arith.constant 0 : index
    %c0_7 = arith.constant 0 : index
    %9 = vector.load %arg7[%c0_6, %c0_7] : memref<8x128xf32, #tpu.memory_space<vmem>>, vector<8x128xf32>
    tpu.vector_store %arg7[%c0_6, %c0_7], %8 {strides = array<i32>} : memref<8x128xf32, #tpu.memory_space<vmem>>, vector<8x128xf32>,
    %c0_8 = arith.constant 0 : index
    %c0_9 = arith.constant 0 : index
    %10 = vector.load %arg5[%c0_8, %c0_9] : memref<1x32xf32, #tpu.memory_space<vmem>>, vector<1x32xf32>
    %c0_10 = arith.constant 0 : index
    %c0_11 = arith.constant 0 : index
    %11 = vector.load %arg6[%c0_10, %c0_11] : memref<1x32xf32, #tpu.memory_space<vmem>>, vector<1x32xf32>
    %c0_i32_12 = arith.constant 0 : i32
    %c1_i32 = arith.constant 1 : i32
    %12 = arith.muli %c0_i32_12, %c1_i32 : i32
    %13 = arith.index_cast %12 : i32 to index
    %c0_13 = arith.constant 0 : index
    %14 = vector.load %arg7[%13, %c0_13] : memref<8x128xf32, #tpu.memory_space<vmem>>, vector<1x128xf32>
    %c0_14 = arith.constant 0 : index
    %c0_15 = arith.constant 0 : index
    %15 = vector.load %arg3[%c0_14, %c0_15] : memref<32x128xf32, #tpu.memory_space<vmem>>, vector<32x128xf32>
    %cst_16 = arith.constant dense<0.000000e+00> : vector<1x128xf32>
    %16 = tpu.matmul %11, %15, %cst_16 {dimension_numbers = #tpu.dot_dimension_numbers<[1], [0], [0], [1], [0, 0, 1, 1], [], []>} : vector<1x32xf32>, vector<32x128xf32>, vector<1x128xf32> -> vector<1x128xf32>
    %17 = arith.addf %14, %16 : vector<1x128xf32>
    %18 = vector.extract_strided_slice %17 {offsets = [0, 0], sizes = [1, 32], strides = [1, 1]} : vector<1x128xf32> to vector<1x32xf32>
    %19 = arith.negf %18 : vector<1x32xf32>
    %20 = math.exp %19 : vector<1x32xf32>
    %cst_17 = arith.constant 1.000000e+00 : f32
    %21 = vector.broadcast %cst_17 : f32 to vector<1x32xf32>
    %22 = arith.addf %21, %20 : vector<1x32xf32>
    %23 = arith.divf %21, %22 : vector<1x32xf32>
    %24 = vector.extract_strided_slice %17 {offsets = [0, 32], sizes = [1, 32], strides = [1, 1]} : vector<1x128xf32> to vector<1x32xf32>
    %25 = arith.negf %24 : vector<1x32xf32>
    %26 = math.exp %25 : vector<1x32xf32>
    %cst_18 = arith.constant 1.000000e+00 : f32
    %27 = vector.broadcast %cst_18 : f32 to vector<1x32xf32>
    %28 = arith.addf %27, %26 : vector<1x32xf32>
    %29 = arith.divf %27, %28 : vector<1x32xf32>
    %30 = vector.extract_strided_slice %17 {offsets = [0, 64], sizes = [1, 32], strides = [1, 1]} : vector<1x128xf32> to vector<1x32xf32>
    %31 = arith.negf %30 : vector<1x32xf32>
    %32 = math.exp %31 : vector<1x32xf32>
    %cst_19 = arith.constant 1.000000e+00 : f32
    %33 = vector.broadcast %cst_19 : f32 to vector<1x32xf32>
    %34 = arith.addf %33, %32 : vector<1x32xf32>
    %35 = arith.divf %33, %34 : vector<1x32xf32>
    %36 = vector.extract_strided_slice %17 {offsets = [0, 96], sizes = [1, 32], strides = [1, 1]} : vector<1x128xf32> to vector<1x32xf32>
    %37 = math.tanh %36 : vector<1x32xf32>
    %38 = arith.mulf %23, %37 : vector<1x32xf32>
    %39 = arith.mulf %35, %10 : vector<1x32xf32>
    %40 = arith.addf %38, %39 : vector<1x32xf32>
    %41 = math.tanh %40 : vector<1x32xf32>
    %42 = arith.mulf %29, %41 : vector<1x32xf32>
    %c1_i32_20 = arith.constant 1 : i32
    %c1_i32_21 = arith.constant 1 : i32
    %43 = arith.muli %c1_i32_20, %c1_i32_21 : i32
    %44 = arith.index_cast %43 : i32 to index
    %c0_22 = arith.constant 0 : index
    %45 = vector.load %arg7[%44, %c0_22] : memref<8x128xf32, #tpu.memory_space<vmem>>, vector<1x128xf32>
    %c0_23 = arith.constant 0 : index
    %c0_24 = arith.constant 0 : index
    %46 = vector.load %arg3[%c0_23, %c0_24] : memref<32x128xf32, #tpu.memory_space<vmem>>, vector<32x128xf32>
    %cst_25 = arith.constant dense<0.000000e+00> : vector<1x128xf32>
    %47 = tpu.matmul %42, %46, %cst_25 {dimension_numbers = #tpu.dot_dimension_numbers<[1], [0], [0], [1], [0, 0, 1, 1], [], []>} : vector<1x32xf32>, vector<32x128xf32>, vector<1x128xf32> -> vector<1x128xf32>
    %48 = arith.addf %45, %47 : vector<1x128xf32>
    %49 = vector.extract_strided_slice %48 {offsets = [0, 0], sizes = [1, 32], strides = [1, 1]} : vector<1x128xf32> to vector<1x32xf32>
    %50 = arith.negf %49 : vector<1x32xf32>
    %51 = math.exp %50 : vector<1x32xf32>
    %cst_26 = arith.constant 1.000000e+00 : f32
    %52 = vector.broadcast %cst_26 : f32 to vector<1x32xf32>
    %53 = arith.addf %52, %51 : vector<1x32xf32>
    %54 = arith.divf %52, %53 : vector<1x32xf32>
    %55 = vector.extract_strided_slice %48 {offsets = [0, 32], sizes = [1, 32], strides = [1, 1]} : vector<1x128xf32> to vector<1x32xf32>
    %56 = arith.negf %55 : vector<1x32xf32>
    %57 = math.exp %56 : vector<1x32xf32>
    %cst_27 = arith.constant 1.000000e+00 : f32
    %58 = vector.broadcast %cst_27 : f32 to vector<1x32xf32>
    %59 = arith.addf %58, %57 : vector<1x32xf32>
    %60 = arith.divf %58, %59 : vector<1x32xf32>
    %61 = vector.extract_strided_slice %48 {offsets = [0, 64], sizes = [1, 32], strides = [1, 1]} : vector<1x128xf32> to vector<1x32xf32>
    %62 = arith.negf %61 : vector<1x32xf32>
    %63 = math.exp %62 : vector<1x32xf32>
    %cst_28 = arith.constant 1.000000e+00 : f32
    %64 = vector.broadcast %cst_28 : f32 to vector<1x32xf32>
    %65 = arith.addf %64, %63 : vector<1x32xf32>
    %66 = arith.divf %64, %65 : vector<1x32xf32>
    %67 = vector.extract_strided_slice %48 {offsets = [0, 96], sizes = [1, 32], strides = [1, 1]} : vector<1x128xf32> to vector<1x32xf32>
    %68 = math.tanh %67 : vector<1x32xf32>
    %69 = arith.mulf %54, %68 : vector<1x32xf32>
    %70 = arith.mulf %66, %40 : vector<1x32xf32>
    %71 = arith.addf %69, %70 : vector<1x32xf32>
    %72 = math.tanh %71 : vector<1x32xf32>
    %73 = arith.mulf %60, %72 : vector<1x32xf32>
    %c2_i32 = arith.constant 2 : i32
    %c1_i32_29 = arith.constant 1 : i32
    %74 = arith.muli %c2_i32, %c1_i32_29 : i32
    %75 = arith.index_cast %74 : i32 to index
    %c0_30 = arith.constant 0 : index
    %76 = vector.load %arg7[%75, %c0_30] : memref<8x128xf32, #tpu.memory_space<vmem>>, vector<1x128xf32>
    %c0_31 = arith.constant 0 : index
    %c0_32 = arith.constant 0 : index
    %77 = vector.load %arg3[%c0_31, %c0_32] : memref<32x128xf32, #tpu.memory_space<vmem>>, vector<32x128xf32>
    %cst_33 = arith.constant dense<0.000000e+00> : vector<1x128xf32>
    %78 = tpu.matmul %73, %77, %cst_33 {dimension_numbers = #tpu.dot_dimension_numbers<[1], [0], [0], [1], [0, 0, 1, 1], [], []>} : vector<1x32xf32>, vector<32x128xf32>, vector<1x128xf32> -> vector<1x128xf32>
    %79 = arith.addf %76, %78 : vector<1x128xf32>
    %80 = vector.extract_strided_slice %79 {offsets = [0, 0], sizes = [1, 32], strides = [1, 1]} : vector<1x128xf32> to vector<1x32xf32>
    %81 = arith.negf %80 : vector<1x32xf32>
    %82 = math.exp %81 : vector<1x32xf32>
    %cst_34 = arith.constant 1.000000e+00 : f32
    %83 = vector.broadcast %cst_34 : f32 to vector<1x32xf32>
    %84 = arith.addf %83, %82 : vector<1x32xf32>
    %85 = arith.divf %83, %84 : vector<1x32xf32>
    %86 = vector.extract_strided_slice %79 {offsets = [0, 32], sizes = [1, 32], strides = [1, 1]} : vector<1x128xf32> to vector<1x32xf32>
    %87 = arith.negf %86 : vector<1x32xf32>
    %88 = math.exp %87 : vector<1x32xf32>
    %cst_35 = arith.constant 1.000000e+00 : f32
    %89 = vector.broadcast %cst_35 : f32 to vector<1x32xf32>
    %90 = arith.addf %89, %88 : vector<1x32xf32>
    %91 = arith.divf %89, %90 : vector<1x32xf32>
    %92 = vector.extract_strided_slice %79 {offsets = [0, 64], sizes = [1, 32], strides = [1, 1]} : vector<1x128xf32> to vector<1x32xf32>
    %93 = arith.negf %92 : vector<1x32xf32>
    %94 = math.exp %93 : vector<1x32xf32>
    %cst_36 = arith.constant 1.000000e+00 : f32
    %95 = vector.broadcast %cst_36 : f32 to vector<1x32xf32>
    %96 = arith.addf %95, %94 : vector<1x32xf32>
    %97 = arith.divf %95, %96 : vector<1x32xf32>
    %98 = vector.extract_strided_slice %79 {offsets = [0, 96], sizes = [1, 32], strides = [1, 1]} : vector<1x128xf32> to vector<1x32xf32>
    %99 = math.tanh %98 : vector<1x32xf32>
    %100 = arith.mulf %85, %99 : vector<1x32xf32>
    %101 = arith.mulf %97, %71 : vector<1x32xf32>
    %102 = arith.addf %100, %101 : vector<1x32xf32>
    %103 = math.tanh %102 : vector<1x32xf32>
    %104 = arith.mulf %91, %103 : vector<1x32xf32>
    %c3_i32 = arith.constant 3 : i32
    %c1_i32_37 = arith.constant 1 : i32
    %105 = arith.muli %c3_i32, %c1_i32_37 : i32
    %106 = arith.index_cast %105 : i32 to index
    %c0_38 = arith.constant 0 : index
    %107 = vector.load %arg7[%106, %c0_38] : memref<8x128xf32, #tpu.memory_space<vmem>>, vector<1x128xf32>
    %c0_39 = arith.constant 0 : index
    %c0_40 = arith.constant 0 : index
    %108 = vector.load %arg3[%c0_39, %c0_40] : memref<32x128xf32, #tpu.memory_space<vmem>>, vector<32x128xf32>
    %cst_41 = arith.constant dense<0.000000e+00> : vector<1x128xf32>
    %109 = tpu.matmul %104, %108, %cst_41 {dimension_numbers = #tpu.dot_dimension_numbers<[1], [0], [0], [1], [0, 0, 1, 1], [], []>} : vector<1x32xf32>, vector<32x128xf32>, vector<1x128xf32> -> vector<1x128xf32>
    %110 = arith.addf %107, %109 : vector<1x128xf32>
    %111 = vector.extract_strided_slice %110 {offsets = [0, 0], sizes = [1, 32], strides = [1, 1]} : vector<1x128xf32> to vector<1x32xf32>
    %112 = arith.negf %111 : vector<1x32xf32>
    %113 = math.exp %112 : vector<1x32xf32>
    %cst_42 = arith.constant 1.000000e+00 : f32
    %114 = vector.broadcast %cst_42 : f32 to vector<1x32xf32>
    %115 = arith.addf %114, %113 : vector<1x32xf32>
    %116 = arith.divf %114, %115 : vector<1x32xf32>
    %117 = vector.extract_strided_slice %110 {offsets = [0, 32], sizes = [1, 32], strides = [1, 1]} : vector<1x128xf32> to vector<1x32xf32>
    %118 = arith.negf %117 : vector<1x32xf32>
    %119 = math.exp %118 : vector<1x32xf32>
    %cst_43 = arith.constant 1.000000e+00 : f32
    %120 = vector.broadcast %cst_43 : f32 to vector<1x32xf32>
    %121 = arith.addf %120, %119 : vector<1x32xf32>
    %122 = arith.divf %120, %121 : vector<1x32xf32>
    %123 = vector.extract_strided_slice %110 {offsets = [0, 64], sizes = [1, 32], strides = [1, 1]} : vector<1x128xf32> to vector<1x32xf32>
    %124 = arith.negf %123 : vector<1x32xf32>
    %125 = math.exp %124 : vector<1x32xf32>
    %cst_44 = arith.constant 1.000000e+00 : f32
    %126 = vector.broadcast %cst_44 : f32 to vector<1x32xf32>
    %127 = arith.addf %126, %125 : vector<1x32xf32>
    %128 = arith.divf %126, %127 : vector<1x32xf32>
    %129 = vector.extract_strided_slice %110 {offsets = [0, 96], sizes = [1, 32], strides = [1, 1]} : vector<1x128xf32> to vector<1x32xf32>
    %130 = math.tanh %129 : vector<1x32xf32>
    %131 = arith.mulf %116, %130 : vector<1x32xf32>
    %132 = arith.mulf %128, %102 : vector<1x32xf32>
    %133 = arith.addf %131, %132 : vector<1x32xf32>
    %134 = math.tanh %133 : vector<1x32xf32>
    %135 = arith.mulf %122, %134 : vector<1x32xf32>
    %c4_i32 = arith.constant 4 : i32
    %c1_i32_45 = arith.constant 1 : i32
    %136 = arith.muli %c4_i32, %c1_i32_45 : i32
    %137 = arith.index_cast %136 : i32 to index
    %c0_46 = arith.constant 0 : index
    %138 = vector.load %arg7[%137, %c0_46] : memref<8x128xf32, #tpu.memory_space<vmem>>, vector<1x128xf32>
    %c0_47 = arith.constant 0 : index
    %c0_48 = arith.constant 0 : index
    %139 = vector.load %arg3[%c0_47, %c0_48] : memref<32x128xf32, #tpu.memory_space<vmem>>, vector<32x128xf32>
    %cst_49 = arith.constant dense<0.000000e+00> : vector<1x128xf32>
    %140 = tpu.matmul %135, %139, %cst_49 {dimension_numbers = #tpu.dot_dimension_numbers<[1], [0], [0], [1], [0, 0, 1, 1], [], []>} : vector<1x32xf32>, vector<32x128xf32>, vector<1x128xf32> -> vector<1x128xf32>
    %141 = arith.addf %138, %140 : vector<1x128xf32>
    %142 = vector.extract_strided_slice %141 {offsets = [0, 0], sizes = [1, 32], strides = [1, 1]} : vector<1x128xf32> to vector<1x32xf32>
    %143 = arith.negf %142 : vector<1x32xf32>
    %144 = math.exp %143 : vector<1x32xf32>
    %cst_50 = arith.constant 1.000000e+00 : f32
    %145 = vector.broadcast %cst_50 : f32 to vector<1x32xf32>
    %146 = arith.addf %145, %144 : vector<1x32xf32>
    %147 = arith.divf %145, %146 : vector<1x32xf32>
    %148 = vector.extract_strided_slice %141 {offsets = [0, 32], sizes = [1, 32], strides = [1, 1]} : vector<1x128xf32> to vector<1x32xf32>
    %149 = arith.negf %148 : vector<1x32xf32>
    %150 = math.exp %149 : vector<1x32xf32>
    %cst_51 = arith.constant 1.000000e+00 : f32
    %151 = vector.broadcast %cst_51 : f32 to vector<1x32xf32>
    %152 = arith.addf %151, %150 : vector<1x32xf32>
    %153 = arith.divf %151, %152 : vector<1x32xf32>
    %154 = vector.extract_strided_slice %141 {offsets = [0, 64], sizes = [1, 32], strides = [1, 1]} : vector<1x128xf32> to vector<1x32xf32>
    %155 = arith.negf %154 : vector<1x32xf32>
    %156 = math.exp %155 : vector<1x32xf32>
    %cst_52 = arith.constant 1.000000e+00 : f32
    %157 = vector.broadcast %cst_52 : f32 to vector<1x32xf32>
    %158 = arith.addf %157, %156 : vector<1x32xf32>
    %159 = arith.divf %157, %158 : vector<1x32xf32>
    %160 = vector.extract_strided_slice %141 {offsets = [0, 96], sizes = [1, 32], strides = [1, 1]} : vector<1x128xf32> to vector<1x32xf32>
    %161 = math.tanh %160 : vector<1x32xf32>
    %162 = arith.mulf %147, %161 : vector<1x32xf32>
    %163 = arith.mulf %159, %133 : vector<1x32xf32>
    %164 = arith.addf %162, %163 : vector<1x32xf32>
    %165 = math.tanh %164 : vector<1x32xf32>
    %166 = arith.mulf %153, %165 : vector<1x32xf32>
    %c5_i32 = arith.constant 5 : i32
    %c1_i32_53 = arith.constant 1 : i32
    %167 = arith.muli %c5_i32, %c1_i32_53 : i32
    %168 = arith.index_cast %167 : i32 to index
    %c0_54 = arith.constant 0 : index
    %169 = vector.load %arg7[%168, %c0_54] : memref<8x128xf32, #tpu.memory_space<vmem>>, vector<1x128xf32>
    %c0_55 = arith.constant 0 : index
    %c0_56 = arith.constant 0 : index
    %170 = vector.load %arg3[%c0_55, %c0_56] : memref<32x128xf32, #tpu.memory_space<vmem>>, vector<32x128xf32>
    %cst_57 = arith.constant dense<0.000000e+00> : vector<1x128xf32>
    %171 = tpu.matmul %166, %170, %cst_57 {dimension_numbers = #tpu.dot_dimension_numbers<[1], [0], [0], [1], [0, 0, 1, 1], [], []>} : vector<1x32xf32>, vector<32x128xf32>, vector<1x128xf32> -> vector<1x128xf32>
    %172 = arith.addf %169, %171 : vector<1x128xf32>
    %173 = vector.extract_strided_slice %172 {offsets = [0, 0], sizes = [1, 32], strides = [1, 1]} : vector<1x128xf32> to vector<1x32xf32>
    %174 = arith.negf %173 : vector<1x32xf32>
    %175 = math.exp %174 : vector<1x32xf32>
    %cst_58 = arith.constant 1.000000e+00 : f32
    %176 = vector.broadcast %cst_58 : f32 to vector<1x32xf32>
    %177 = arith.addf %176, %175 : vector<1x32xf32>
    %178 = arith.divf %176, %177 : vector<1x32xf32>
    %179 = vector.extract_strided_slice %172 {offsets = [0, 32], sizes = [1, 32], strides = [1, 1]} : vector<1x128xf32> to vector<1x32xf32>
    %180 = arith.negf %179 : vector<1x32xf32>
    %181 = math.exp %180 : vector<1x32xf32>
    %cst_59 = arith.constant 1.000000e+00 : f32
    %182 = vector.broadcast %cst_59 : f32 to vector<1x32xf32>
    %183 = arith.addf %182, %181 : vector<1x32xf32>
    %184 = arith.divf %182, %183 : vector<1x32xf32>
    %185 = vector.extract_strided_slice %172 {offsets = [0, 64], sizes = [1, 32], strides = [1, 1]} : vector<1x128xf32> to vector<1x32xf32>
    %186 = arith.negf %185 : vector<1x32xf32>
    %187 = math.exp %186 : vector<1x32xf32>
    %cst_60 = arith.constant 1.000000e+00 : f32
    %188 = vector.broadcast %cst_60 : f32 to vector<1x32xf32>
    %189 = arith.addf %188, %187 : vector<1x32xf32>
    %190 = arith.divf %188, %189 : vector<1x32xf32>
    %191 = vector.extract_strided_slice %172 {offsets = [0, 96], sizes = [1, 32], strides = [1, 1]} : vector<1x128xf32> to vector<1x32xf32>
    %192 = math.tanh %191 : vector<1x32xf32>
    %193 = arith.mulf %178, %192 : vector<1x32xf32>
    %194 = arith.mulf %190, %164 : vector<1x32xf32>
    %195 = arith.addf %193, %194 : vector<1x32xf32>
    %196 = math.tanh %195 : vector<1x32xf32>
    %197 = arith.mulf %184, %196 : vector<1x32xf32>
    %c6_i32 = arith.constant 6 : i32
    %c1_i32_61 = arith.constant 1 : i32
    %198 = arith.muli %c6_i32, %c1_i32_61 : i32
    %199 = arith.index_cast %198 : i32 to index
    %c0_62 = arith.constant 0 : index
    %200 = vector.load %arg7[%199, %c0_62] : memref<8x128xf32, #tpu.memory_space<vmem>>, vector<1x128xf32>
    %c0_63 = arith.constant 0 : index
    %c0_64 = arith.constant 0 : index
    %201 = vector.load %arg3[%c0_63, %c0_64] : memref<32x128xf32, #tpu.memory_space<vmem>>, vector<32x128xf32>
    %cst_65 = arith.constant dense<0.000000e+00> : vector<1x128xf32>
    %202 = tpu.matmul %197, %201, %cst_65 {dimension_numbers = #tpu.dot_dimension_numbers<[1], [0], [0], [1], [0, 0, 1, 1], [], []>} : vector<1x32xf32>, vector<32x128xf32>, vector<1x128xf32> -> vector<1x128xf32>
    %203 = arith.addf %200, %202 : vector<1x128xf32>
    %204 = vector.extract_strided_slice %203 {offsets = [0, 0], sizes = [1, 32], strides = [1, 1]} : vector<1x128xf32> to vector<1x32xf32>
    %205 = arith.negf %204 : vector<1x32xf32>
    %206 = math.exp %205 : vector<1x32xf32>
    %cst_66 = arith.constant 1.000000e+00 : f32
    %207 = vector.broadcast %cst_66 : f32 to vector<1x32xf32>
    %208 = arith.addf %207, %206 : vector<1x32xf32>
    %209 = arith.divf %207, %208 : vector<1x32xf32>
    %210 = vector.extract_strided_slice %203 {offsets = [0, 32], sizes = [1, 32], strides = [1, 1]} : vector<1x128xf32> to vector<1x32xf32>
    %211 = arith.negf %210 : vector<1x32xf32>
    %212 = math.exp %211 : vector<1x32xf32>
    %cst_67 = arith.constant 1.000000e+00 : f32
    %213 = vector.broadcast %cst_67 : f32 to vector<1x32xf32>
    %214 = arith.addf %213, %212 : vector<1x32xf32>
    %215 = arith.divf %213, %214 : vector<1x32xf32>
    %216 = vector.extract_strided_slice %203 {offsets = [0, 64], sizes = [1, 32], strides = [1, 1]} : vector<1x128xf32> to vector<1x32xf32>
    %217 = arith.negf %216 : vector<1x32xf32>
    %218 = math.exp %217 : vector<1x32xf32>
    %cst_68 = arith.constant 1.000000e+00 : f32
    %219 = vector.broadcast %cst_68 : f32 to vector<1x32xf32>
    %220 = arith.addf %219, %218 : vector<1x32xf32>
    %221 = arith.divf %219, %220 : vector<1x32xf32>
    %222 = vector.extract_strided_slice %203 {offsets = [0, 96], sizes = [1, 32], strides = [1, 1]} : vector<1x128xf32> to vector<1x32xf32>
    %223 = math.tanh %222 : vector<1x32xf32>
    %224 = arith.mulf %209, %223 : vector<1x32xf32>
    %225 = arith.mulf %221, %195 : vector<1x32xf32>
    %226 = arith.addf %224, %225 : vector<1x32xf32>
    %227 = math.tanh %226 : vector<1x32xf32>
    %228 = arith.mulf %215, %227 : vector<1x32xf32>
    %c7_i32 = arith.constant 7 : i32
    %c1_i32_69 = arith.constant 1 : i32
    %229 = arith.muli %c7_i32, %c1_i32_69 : i32
    %230 = arith.index_cast %229 : i32 to index
    %c0_70 = arith.constant 0 : index
    %231 = vector.load %arg7[%230, %c0_70] : memref<8x128xf32, #tpu.memory_space<vmem>>, vector<1x128xf32>
    %c0_71 = arith.constant 0 : index
    %c0_72 = arith.constant 0 : index
    %232 = vector.load %arg3[%c0_71, %c0_72] : memref<32x128xf32, #tpu.memory_space<vmem>>, vector<32x128xf32>
    %cst_73 = arith.constant dense<0.000000e+00> : vector<1x128xf32>
    %233 = tpu.matmul %228, %232, %cst_73 {dimension_numbers = #tpu.dot_dimension_numbers<[1], [0], [0], [1], [0, 0, 1, 1], [], []>} : vector<1x32xf32>, vector<32x128xf32>, vector<1x128xf32> -> vector<1x128xf32>
    %234 = arith.addf %231, %233 : vector<1x128xf32>
    %235 = vector.extract_strided_slice %234 {offsets = [0, 0], sizes = [1, 32], strides = [1, 1]} : vector<1x128xf32> to vector<1x32xf32>
    %236 = arith.negf %235 : vector<1x32xf32>
    %237 = math.exp %236 : vector<1x32xf32>
    %cst_74 = arith.constant 1.000000e+00 : f32
    %238 = vector.broadcast %cst_74 : f32 to vector<1x32xf32>
    %239 = arith.addf %238, %237 : vector<1x32xf32>
    %240 = arith.divf %238, %239 : vector<1x32xf32>
    %241 = vector.extract_strided_slice %234 {offsets = [0, 32], sizes = [1, 32], strides = [1, 1]} : vector<1x128xf32> to vector<1x32xf32>
    %242 = arith.negf %241 : vector<1x32xf32>
    %243 = math.exp %242 : vector<1x32xf32>
    %cst_75 = arith.constant 1.000000e+00 : f32
    %244 = vector.broadcast %cst_75 : f32 to vector<1x32xf32>
    %245 = arith.addf %244, %243 : vector<1x32xf32>
    %246 = arith.divf %244, %245 : vector<1x32xf32>
    %247 = vector.extract_strided_slice %234 {offsets = [0, 64], sizes = [1, 32], strides = [1, 1]} : vector<1x128xf32> to vector<1x32xf32>
    %248 = arith.negf %247 : vector<1x32xf32>
    %249 = math.exp %248 : vector<1x32xf32>
    %cst_76 = arith.constant 1.000000e+00 : f32
    %250 = vector.broadcast %cst_76 : f32 to vector<1x32xf32>
    %251 = arith.addf %250, %249 : vector<1x32xf32>
    %252 = arith.divf %250, %251 : vector<1x32xf32>
    %253 = vector.extract_strided_slice %234 {offsets = [0, 96], sizes = [1, 32], strides = [1, 1]} : vector<1x128xf32> to vector<1x32xf32>
    %254 = math.tanh %253 : vector<1x32xf32>
    %255 = arith.mulf %240, %254 : vector<1x32xf32>
    %256 = arith.mulf %252, %226 : vector<1x32xf32>
    %257 = arith.addf %255, %256 : vector<1x32xf32>
    %258 = math.tanh %257 : vector<1x32xf32>
    %259 = arith.mulf %246, %258 : vector<1x32xf32>
    %c8_i32 = arith.constant 8 : i32
    %c0_77 = arith.constant 0 : index
    %c0_78 = arith.constant 0 : index
    %260 = vector.load %arg5[%c0_77, %c0_78] : memref<1x32xf32, #tpu.memory_space<vmem>>, vector<1x32xf32>
    tpu.vector_store %arg5[%c0_77, %c0_78], %257 {strides = array<i32>} : memref<1x32xf32, #tpu.memory_space<vmem>>, vector<1x32xf32>,
    %c0_79 = arith.constant 0 : index
    %c0_80 = arith.constant 0 : index
    %261 = vector.load %arg6[%c0_79, %c0_80] : memref<1x32xf32, #tpu.memory_space<vmem>>, vector<1x32xf32>
    tpu.vector_store %arg6[%c0_79, %c0_80], %259 {strides = array<i32>} : memref<1x32xf32, #tpu.memory_space<vmem>>, vector<1x32xf32>,
    return
  }
  func.func @transform_0(%arg0: i32) -> (i32, i32) {
    %c0_i32 = arith.constant 0 : i32
    %c0_i32_0 = arith.constant 0 : i32
    return %arg0, %c0_i32 : i32, i32
  }
  func.func @transform_1(%arg0: i32) -> (i32, i32) {
    %c0_i32 = arith.constant 0 : i32
    %c0_i32_0 = arith.constant 0 : i32
    %c0_i32_1 = arith.constant 0 : i32
    return %c0_i32, %c0_i32_0 : i32, i32
  }
  func.func @transform_2(%arg0: i32) -> (i32, i32) {
    %c0_i32 = arith.constant 0 : i32
    %c0_i32_0 = arith.constant 0 : i32
    %c0_i32_1 = arith.constant 0 : i32
    return %c0_i32, %c0_i32_0 : i32, i32
  }
  func.func @transform_3(%arg0: i32) -> (i32, i32) {
    %c0_i32 = arith.constant 0 : i32
    %c0_i32_0 = arith.constant 0 : i32
    %c0_i32_1 = arith.constant 0 : i32
    return %c0_i32, %c0_i32_0 : i32, i32
  }
  func.func @transform_4(%arg0: i32) -> (i32, i32) {
    %c0_i32 = arith.constant 0 : i32
    %c0_i32_0 = arith.constant 0 : i32
    %c0_i32_1 = arith.constant 0 : i32
    return %c0_i32, %c0_i32_0 : i32, i32
  }
  func.func @transform_5(%arg0: i32) -> (i32, i32) {
    %c0_i32 = arith.constant 0 : i32
    %c0_i32_0 = arith.constant 0 : i32
    %c0_i32_1 = arith.constant 0 : i32
    return %c0_i32, %c0_i32_0 : i32, i32
  }
}

</mosaic_0001>

<bundles_post_ra>
// kernel: tpu_custom_call.1
= control target key start
LH: loop header
LB: loop body
LE: loop exit
PB: predicated region body
PF: predicated region fallthrough
CT: control target
= control target key end

     0   :  { %11 = vsyncpa [#allocation4], 0  ;;  %s1662_s0 = inlined_call_operand.hbm [shape: f32[8,16], index: 0, kind: input, shape index: {}]   ;;  %s1663_s1 = inlined_call_operand.hbm [shape: f32[16,128], index: 1, kind: input, shape index: {}]   ;;  %s1664_s2 = inlined_call_operand.hbm [shape: f32[32,128], index: 2, kind: input, shape index: {}]   ;;  %s1665_s3 = inlined_call_operand.vmem [shape: f32[1,128], index: 3, kind: input, shape index: {}]   ;;  %s1666_s4 = inlined_call_operand.hbm [shape: f32[1,32], index: 4, kind: output, shape index: {0}]   ;;  %s1667_s5 = inlined_call_operand.hbm [shape: f32[1,32], index: 5, kind: output, shape index: {1}]  }
   0x1   :  { %12 = vsyncpa [#allocation7], 0 }
   0x2   :  { %13 = vsyncpa [#allocation5], 0 }
   0x3   :  { %14 = vsyncpa [#allocation11], 0  ;;  %s1441_s18 = smov [#allocation6]   ;;  %s1323_s22 = scalar_lea.hbm %s1663_s1, 256 }
   0x4   :  { %s30_s19 = sshll.u32 %s1441_s18, 4  ;;  %p1324_p0 = scmp.ne.s32.totalorder %s1663_s1, %s1323_s22  ;;  %s31_s19 = int_to_ptr.vmem [resolvable:$true] %s30_s19 }
   0x5   :  { %p1327_p1 = scmp.lt.u32.totalorder %s1323_s22, %s1663_s1 }
   0x7   :  { %p1329_p2 = pnand %p1327_p1, %p1324_p0 }
   0x9   :  { %1332 = shalt.err (!%p1329_p2)
}
   0xa   :  { %s1333_s27 = scalar_lea.vmem %s31_s19, 256  ;;  %p1338_p4 = scmp.lt.s32.totalorder %s31_s19, %s31_s19 }
   0xb   :  { %p1334_p3 = scmp.ne.s32.totalorder %s31_s19, %s1333_s27  ;;  %p1339_p5 = scmp.lt.s32.totalorder %s1333_s27, %s1333_s27 }
   0xd   :  { %p1340_p6 = por %p1339_p5, %p1338_p4 }
   0xf   :  { %p1341_p7 = pnand %p1340_p6, %p1334_p3 }
  0x11   :  { %1344 = shalt.err (!%p1341_p7)
}
  0x12   :  { %s1442_s28 = smov 128   ;;  %s1443_s29 = smov 8  }
  0x13   :  { %36 = dma.hbm_to_vmem [thread:$0]  %s1663_s1, 256, %s31_s19, [#allocation7], %s1442_s28, %s1442_s28, %s1443_s29  }
  0x14   :  { %s1444_s7 = smov [#allocation3]   ;;  %s1445_s9 = smov [#allocation8]  }
  0x15   :  { %s21_s8 = sshll.u32 %s1444_s7, 4  ;;  %s42_s10 = sshll.u32 %s1445_s9, 4  ;;  %s22_s8 = int_to_ptr.vmem [resolvable:$true] %s21_s8  ;;  %s43_s10 = int_to_ptr.vmem [resolvable:$true] %s42_s10 }
  0x16   :  { %s1345_s13 = scalar_lea.hbm %s1662_s0, 128 }
  0x17   :  { %p1346_p8 = scmp.ne.s32.totalorder %s1662_s0, %s1345_s13  ;;  %p1349_p9 = scmp.lt.u32.totalorder %s1345_s13, %s1662_s0 }
  0x19   :  { %p1351_p10 = pnand %p1349_p9, %p1346_p8 }
  0x1b   :  { %1354 = shalt.err (!%p1351_p10)
}
  0x1c   :  { %s1355_s1 = scalar_lea.vmem %s22_s8, 128  ;;  %p1360_p12 = scmp.lt.s32.totalorder %s22_s8, %s22_s8 }
  0x1d   :  { %p1356_p11 = scmp.ne.s32.totalorder %s22_s8, %s1355_s1  ;;  %p1361_p13 = scmp.lt.s32.totalorder %s1355_s1, %s1355_s1 }
  0x1f   :  { %p1362_p0 = por %p1361_p13, %p1360_p12 }
  0x21   :  { %p1363_p1 = pnand %p1362_p0, %p1356_p11 }
  0x23   :  { %1366 = shalt.err (!%p1363_p1)
}
  0x24   :  { %24 = dma.hbm_to_vmem [thread:$0]  %s1662_s0, 128, %s22_s8, [#allocation4]  }
  0x25   :  { %s1367_s22 = scalar_lea.hbm %s1664_s2, 512 }
  0x26   :  { %p1368_p2 = scmp.ne.s32.totalorder %s1664_s2, %s1367_s22  ;;  %p1371_p3 = scmp.lt.u32.totalorder %s1367_s22, %s1664_s2 }
  0x28   :  { %p1373_p4 = pnand %p1371_p3, %p1368_p2 }
  0x2a   :  { %1376 = shalt.err (!%p1373_p4)
}
  0x2b   :  { %s1377_s27 = scalar_lea.vmem %s43_s10, 512  ;;  %p1382_p6 = scmp.lt.s32.totalorder %s43_s10, %s43_s10 }
  0x2c   :  { %p1378_p5 = scmp.ne.s32.totalorder %s43_s10, %s1377_s27  ;;  %p1383_p7 = scmp.lt.s32.totalorder %s1377_s27, %s1377_s27 }
  0x2e   :  { %p1384_p8 = por %p1383_p7, %p1382_p6 }
  0x30   :  { %p1385_p9 = pnand %p1384_p8, %p1378_p5 }
  0x32   :  { %1388 = shalt.err (!%p1385_p9)
}
  0x33   :  { %48 = dma.hbm_to_vmem [thread:$0]  %s1664_s2, 512, %s43_s10, [#allocation7], %s1442_s28, %s1442_s28, %s1443_s29  }
  0x34   :  { %1433 = dma.done.wait [#allocation4], 128  }
  0x35   :  { %1434 = vsyncadd [#allocation4], 4294967168 }
  0x36   :  { %1435 = dma.done.wait [#allocation7], 768  }
  0x37   :  { %1436 = vsyncadd [#allocation7], 4294966528  ;;  %v1446_v0 = vmov 0.0|0.0   ;;  %vm1447_vm0 = vmmov 0   ;;  %v1448_v1 = vmov 0.0   ;;  %vm64_vm1 = vcmask 253952  }
  0x38   :  { %1195 = vmatprep.subr.bf16.mxu0 %v1446_v0  ;;  %1104 = vmatprep.mubr.msk.f32.mxu0 %vm1447_vm0, %v1448_v1  ;;  %66 = vst.msk [vmem:[#allocation10] sm:$0x1] %vm64_vm1, %v1448_v1  ;;  %65 = vst.msk [vmem:[#allocation9] sm:$0x1] %vm64_vm1, %v1448_v1  ;;  %v68_v2 = vld [vmem:[#allocation6] sm:$0xff]  ;;  %v69_v3 = vld [vmem:[#allocation6 + $0x8] sm:$0xff] }
  0x39   :  { %1198 = vmatprep.subr.bf16.mxu1 %v1446_v0  ;;  %1115 = vmatprep.mubr.msk.f32.mxu1 %vm1447_vm0, %v1448_v1  ;;  %v1196_v4 = vpack.c.bf16 %v69_v3, %v68_v2  ;;  %v155_v5 = vld [vmem:[#allocation8] sm:$0xff]  ;;  %v156_v6 = vld [vmem:[#allocation8 + $0x8] sm:$0xff]  ;;  %v157_v7 = vld [vmem:[#allocation8 + $0x10] sm:$0xff]  ;;  %vm77_vm2 = vcmask 130048   ;;  %s1449_s2 = smov 64   ;;  %vm159_vm3 = vcmask 261120  }
  0x3a   :  { %v1536_v8 = vpack.c.bf16 %v156_v6, %v155_v5  ;;  %v158_v9 = vld [vmem:[#allocation8 + $0x18] sm:$0xff]  ;;  %v67_v11 = vld [vmem:[#allocation3] sm:$0xff]  ;;  %v1038_v14 = vld [vmem:[%s1665_s3] ss:$0 sm:$0xff]  ;;  %s1450_s6 = smov 32   ;;  %s1451_s3 = smov 96  }
  0x3b   :  { %1197 = vmatpush3.bf16.msra.mxu0 %v1196_v4  ;;  %v1540_v12 = vpack.c.bf16 %v158_v9, %v157_v7  ;;  %s1452_s7 = smov [#allocation9]  }
  0x3c   :  { %1200 = vmatpush3.bf16.msra.mxu1 %v1536_v8  ;;  %1204 = vmatprep.subr.bf16.mxu0 %v1446_v0  ;;  %s1014_s8 = sshll.u32 %s1452_s7, 4  ;;  %s1015_s8 = int_to_ptr.vmem [resolvable:$true] %s1014_s8 }
  0x3d   :  { %1201 = vmatprep.subr.bf16.mxu1 %v1446_v0  ;;  %s1389_s9 = scalar_lea.vmem %s1015_s8, 16  ;;  %s1393_s10 = scalar_lea.vmem %s1015_s8, 32 }
  0x3e   :  { %1105 = vmatmul.mubr.msk.f32.vlgmr.msra.gmra.mrb[0].mxu0 %vm77_vm2, %v67_v11  ;;  %p1390_p10 = scmp.ne.s32.totalorder %s1015_s8, %s1389_s9  ;;  %p1394_p11 = scmp.lt.s32.totalorder %s1015_s8, %s1015_s8 }
  0x3f   :  { %v1042_v10 = vld [vmem:[#allocation9] ss:$0 sm:$0xff]  ;;  %1206 = vmatpush3.bf16.msra.mxu0 %v1536_v8  ;;  %1126 = vmatprep.mubr.msk.f32.mxu0 %vm1447_vm0, %v1448_v1  ;;  %v153_v13 = vld [vmem:[#allocation10] sm:$0x1]  ;;  %p1395_p12 = scmp.lt.s32.totalorder %s1393_s10, %s1389_s9 }
  0x40   :  { %251 = vrot.lane.b32.xlu0 %v1042_v10, %s1449_s2  ;;  %1203 = vmatpush3.bf16.msra.mxu1 %v1540_v12 }
  0x41   :  { %1207 = vmatprep.subr.bf16.mxu0 %v1446_v0  ;;  %1210 = vmatprep.subr.bf16.mxu1 %v1446_v0  ;;  %p1396_p13 = por %p1395_p12, %p1394_p11 }
  0x43   :  { %1116 = vmatmul.mubr.msk.f32.vlgmr.msra.gmra.mrb[0].mxu1 %vm159_vm3, %v153_v13  ;;  %1209 = vmatpush3.bf16.msra.mxu0 %v1540_v12  ;;  %p1397_p0 = pnand %p1396_p13, %p1390_p10 }
  0x44   :  { %1212 = vmatpush3.bf16.msra.mxu1 %v1536_v8  ;;  %1137 = vmatprep.mubr.msk.f32.mxu1 %vm1447_vm0, %v1448_v1 }
  0x45   :  { %1213 = vmatprep.subr.bf16.mxu1 %v1446_v0  ;;  %1216 = vmatprep.subr.bf16.mxu0 %v1446_v0 }
  0x48   :  { %1215 = vmatpush3.bf16.msra.mxu1 %v1540_v12 }
  0x49   :  { %1222 = vmatprep.subr.bf16.mxu1 %v1446_v0 }
  0xb2   :  { %v252_v26 = vpop.permute.xlu0 %251 }
 0x111   :  { %v147_v15 = vpop.f32.mrb[0].mxu0 }
 0x112   :  { %v148_v16 = vadd.f32 %v1038_v14, %v147_v15  ;;  %v1106_v17 = vpop.f32.mrb[1].mxu0 }
 0x114   :  { %151 = vst [vmem:[#allocation2] sm:$0xff] %v148_v16 }
 0x116   :  { %v229_v18 = vpop.f32.mrb[0].mxu1 }
 0x117   :  { %v1117_v19 = vpop.f32.mrb[1].mxu1 }
 0x11b   :  { %v154_v20 = vld [vmem:[#allocation2] sm:$0x1]  ;;  %v266_v37 = vld [vmem:[#allocation2 + $0x1] sm:$0x1]  ;;  %v371_v56 = vld [vmem:[#allocation2 + $0x2] sm:$0x1] }
 0x11c   :  { %v233_v21 = vadd.f32 %v229_v18, %v154_v20  ;;  %v476_v15 = vld [vmem:[#allocation2 + $0x3] sm:$0x1] }
 0x11e   :  { %v1041_v22 = vmul.f32 -1.442695, %v233_v21  ;;  %1259 = vtanh.f32 %v233_v21 }
 0x120   :  { %1261 = vpow2.f32 %v1041_v22 }
 0x128   :  { %v1260_v23 = vpop.eup %1259 }
 0x129   :  { %242 = vrot.lane.b32.xlu0 %v1260_v23, %s1450_s6 }
 0x12a   :  { %v1262_v24 = vpop.eup %1261 }
 0x12b   :  { %v237_v25 = vadd.f32 1.0, %v1262_v24 }
 0x12d   :  { %1263 = vrcp.f32 %v237_v25 }
 0x137   :  { %v1264_v27 = vpop.eup %1263 }
 0x138   :  { %v254_v28 = vmul.f32 %v1264_v27, %v252_v26 }
 0x13a   :  { %256 = vrot.lane.b32.xlu1 %v254_v28, %s1449_s2 }
 0x19b   :  { %v243_v29 = vpop.permute.xlu0 %242 }
 0x19c   :  { %v245_v30 = vmul.f32 %v1264_v27, %v243_v29 }
 0x1ac   :  { %v257_v31 = vpop.permute.xlu1 %256 }
 0x1ad   :  { %v259_v32 = vadd.f32 %v257_v31, %v245_v30 }
 0x1af   :  { %1265 = vtanh.f32 %v259_v32 }
 0x1b9   :  { %v1266_v33 = vpop.eup %1265 }
 0x1ba   :  { %262 = vrot.lane.b32.xlu1 %v1266_v33, %s1450_s6 }
 0x1be   :  { %356 = vrot.lane.b32.xlu1 %v259_v32, %s1449_s2 }
 0x22c   :  { %v263_v34 = vpop.permute.xlu1 %262 }
 0x22d   :  { %v265_v35 = vmul.f32 %v1264_v27, %v263_v34  ;;  %v581_v34 = vld [vmem:[#allocation2 + $0x4] sm:$0x1] }
 0x22f   :  { %268 = vrot.lane.b32.xlu0 %v265_v35, %s1451_s3 }
 0x230   :  { %v357_v46 = vpop.permute.xlu1 %356 }
 0x2a1   :  { %v269_v36 = vpop.permute.xlu0 %268 }
 0x2a2   :  { %1127 = vmatmul.mubr.msk.f32.vlgmr.msra.gmra.mrb[2].mxu0 %vm159_vm3, %v269_v36 }
 0x2a3   :  { %1218 = vmatpush3.bf16.msra.mxu0 %v1536_v8  ;;  %1148 = vmatprep.mubr.msk.f32.mxu0 %vm1447_vm0, %v1448_v1 }
 0x2a4   :  { %1219 = vmatprep.subr.bf16.mxu0 %v1446_v0 }
 0x2a7   :  { %1221 = vmatpush3.bf16.msra.mxu0 %v1540_v12 }
 0x2a8   :  { %1228 = vmatprep.subr.bf16.mxu0 %v1446_v0 }
 0x375   :  { %v338_v38 = vpop.f32.mrb[2].mxu0 }
 0x376   :  { %v342_v39 = vadd.f32 %v338_v38, %v266_v37  ;;  %v1128_v40 = vpop.f32.mrb[3].mxu0 }
 0x378   :  { %v1044_v41 = vmul.f32 -1.442695, %v342_v39  ;;  %1267 = vtanh.f32 %v342_v39 }
 0x37a   :  { %1269 = vpow2.f32 %v1044_v41 }
 0x382   :  { %v1268_v42 = vpop.eup %1267 }
 0x383   :  { %351 = vrot.lane.b32.xlu0 %v1268_v42, %s1450_s6 }
 0x384   :  { %v1270_v43 = vpop.eup %1269 }
 0x385   :  { %v346_v44 = vadd.f32 1.0, %v1270_v43 }
 0x387   :  { %1271 = vrcp.f32 %v346_v44 }
 0x391   :  { %v1272_v45 = vpop.eup %1271 }
 0x392   :  { %v359_v47 = vmul.f32 %v1272_v45, %v357_v46 }
 0x394   :  { %361 = vrot.lane.b32.xlu1 %v359_v47, %s1449_s2 }
 0x3f5   :  { %v352_v48 = vpop.permute.xlu0 %351 }
 0x3f6   :  { %v354_v49 = vmul.f32 %v1272_v45, %v352_v48 }
 0x406   :  { %v362_v50 = vpop.permute.xlu1 %361 }
 0x407   :  { %v364_v51 = vadd.f32 %v362_v50, %v354_v49 }
 0x409   :  { %1273 = vtanh.f32 %v364_v51 }
 0x413   :  { %v1274_v52 = vpop.eup %1273 }
 0x414   :  { %367 = vrot.lane.b32.xlu0 %v1274_v52, %s1450_s6 }
 0x418   :  { %461 = vrot.lane.b32.xlu0 %v364_v51, %s1449_s2 }
 0x486   :  { %v368_v53 = vpop.permute.xlu0 %367 }
 0x487   :  { %v370_v54 = vmul.f32 %v1272_v45, %v368_v53  ;;  %v686_v53 = vld [vmem:[#allocation2 + $0x5] sm:$0x1] }
 0x489   :  { %373 = vrot.lane.b32.xlu1 %v370_v54, %s1451_s3 }
 0x48a   :  { %v462_v3 = vpop.permute.xlu0 %461 }
 0x4fb   :  { %v374_v55 = vpop.permute.xlu1 %373 }
 0x4fc   :  { %1138 = vmatmul.mubr.msk.f32.vlgmr.msra.gmra.mrb[2].mxu1 %vm159_vm3, %v374_v55 }
 0x4fd   :  { %1224 = vmatpush3.bf16.msra.mxu1 %v1536_v8  ;;  %1159 = vmatprep.mubr.msk.f32.mxu1 %vm1447_vm0, %v1448_v1 }
 0x4fe   :  { %1225 = vmatprep.subr.bf16.mxu1 %v1446_v0 }
 0x501   :  { %1227 = vmatpush3.bf16.msra.mxu1 %v1540_v12 }
 0x502   :  { %1234 = vmatprep.subr.bf16.mxu1 %v1446_v0 }
 0x5cf   :  { %v443_v57 = vpop.f32.mrb[2].mxu1 }
 0x5d0   :  { %v447_v58 = vadd.f32 %v443_v57, %v371_v56  ;;  %v1139_v59 = vpop.f32.mrb[3].mxu1 }
 0x5d2   :  { %v1046_v60 = vmul.f32 -1.442695, %v447_v58  ;;  %1275 = vtanh.f32 %v447_v58 }
 0x5d4   :  { %1277 = vpow2.f32 %v1046_v60 }
 0x5dc   :  { %v1276_v61 = vpop.eup %1275 }
 0x5dd   :  { %456 = vrot.lane.b32.xlu1 %v1276_v61, %s1450_s6 }
 0x5de   :  { %v1278_v62 = vpop.eup %1277 }
 0x5df   :  { %v451_v63 = vadd.f32 1.0, %v1278_v62 }
 0x5e1   :  { %1279 = vrcp.f32 %v451_v63 }
 0x5eb   :  { %v1280_v2 = vpop.eup %1279 }
 0x5ec   :  { %v464_v4 = vmul.f32 %v1280_v2, %v462_v3 }
 0x5ee   :  { %466 = vrot.lane.b32.xlu0 %v464_v4, %s1449_s2 }
 0x64f   :  { %v457_v5 = vpop.permute.xlu1 %456 }
 0x650   :  { %v459_v6 = vmul.f32 %v1280_v2, %v457_v5 }
 0x660   :  { %v467_v7 = vpop.permute.xlu0 %466 }
 0x661   :  { %v469_v9 = vadd.f32 %v467_v7, %v459_v6  ;;  %v791_v6 = vld [vmem:[#allocation2 + $0x6] sm:$0x1] }
 0x663   :  { %1281 = vtanh.f32 %v469_v9 }
 0x66d   :  { %v1282_v10 = vpop.eup %1281 }
 0x66e   :  { %472 = vrot.lane.b32.xlu1 %v1282_v10, %s1450_s6 }
 0x672   :  { %566 = vrot.lane.b32.xlu1 %v469_v9, %s1449_s2 }
 0x6e0   :  { %v473_v11 = vpop.permute.xlu1 %472 }
 0x6e1   :  { %v475_v13 = vmul.f32 %v1280_v2, %v473_v11 }
 0x6e3   :  { %478 = vrot.lane.b32.xlu0 %v475_v13, %s1451_s3 }
 0x6e4   :  { %v567_v24 = vpop.permute.xlu1 %566 }
 0x755   :  { %v479_v14 = vpop.permute.xlu0 %478 }
 0x756   :  { %1149 = vmatmul.mubr.msk.f32.vlgmr.msra.gmra.mrb[4].mxu0 %vm159_vm3, %v479_v14 }
 0x757   :  { %1230 = vmatpush3.bf16.msra.mxu0 %v1536_v8  ;;  %1170 = vmatprep.mubr.msk.f32.mxu0 %vm1447_vm0, %v1448_v1 }
 0x758   :  { %1231 = vmatprep.subr.bf16.mxu0 %v1446_v0 }
 0x75b   :  { %1233 = vmatpush3.bf16.msra.mxu0 %v1540_v12 }
 0x75c   :  { %1240 = vmatprep.subr.bf16.mxu0 %v1446_v0 }
 0x829   :  { %v548_v16 = vpop.f32.mrb[4].mxu0 }
 0x82a   :  { %v552_v17 = vadd.f32 %v548_v16, %v476_v15  ;;  %v1150_v18 = vpop.f32.mrb[5].mxu0 }
 0x82c   :  { %v1048_v19 = vmul.f32 -1.442695, %v552_v17  ;;  %1283 = vtanh.f32 %v552_v17 }
 0x82e   :  { %1285 = vpow2.f32 %v1048_v19 }
 0x836   :  { %v1284_v20 = vpop.eup %1283 }
 0x837   :  { %561 = vrot.lane.b32.xlu0 %v1284_v20, %s1450_s6 }
 0x838   :  { %v1286_v21 = vpop.eup %1285 }
 0x839   :  { %v556_v22 = vadd.f32 1.0, %v1286_v21 }
 0x83b   :  { %1287 = vrcp.f32 %v556_v22 }
 0x845   :  { %v1288_v23 = vpop.eup %1287 }
 0x846   :  { %v569_v25 = vmul.f32 %v1288_v23, %v567_v24 }
 0x848   :  { %571 = vrot.lane.b32.xlu1 %v569_v25, %s1449_s2 }
 0x8a9   :  { %v562_v26 = vpop.permute.xlu0 %561 }
 0x8aa   :  { %v564_v27 = vmul.f32 %v1288_v23, %v562_v26 }
 0x8ba   :  { %v572_v28 = vpop.permute.xlu1 %571 }
 0x8bb   :  { %v574_v29 = vadd.f32 %v572_v28, %v564_v27  ;;  %v896_v27 = vld [vmem:[#allocation2 + $0x7] sm:$0x1] }
 0x8bd   :  { %1289 = vtanh.f32 %v574_v29 }
 0x8c7   :  { %v1290_v30 = vpop.eup %1289 }
 0x8c8   :  { %577 = vrot.lane.b32.xlu0 %v1290_v30, %s1450_s6 }
 0x8cc   :  { %671 = vrot.lane.b32.xlu0 %v574_v29, %s1449_s2 }
 0x93a   :  { %v578_v31 = vpop.permute.xlu0 %577 }
 0x93b   :  { %v580_v32 = vmul.f32 %v1288_v23, %v578_v31 }
 0x93d   :  { %583 = vrot.lane.b32.xlu1 %v580_v32, %s1451_s3 }
 0x93e   :  { %v672_v43 = vpop.permute.xlu0 %671 }
 0x9af   :  { %v584_v33 = vpop.permute.xlu1 %583 }
 0x9b0   :  { %1160 = vmatmul.mubr.msk.f32.vlgmr.msra.gmra.mrb[4].mxu1 %vm159_vm3, %v584_v33 }
 0x9b1   :  { %1236 = vmatpush3.bf16.msra.mxu1 %v1536_v8  ;;  %1181 = vmatprep.mubr.msk.f32.mxu1 %vm1447_vm0, %v1448_v1 }
 0x9b2   :  { %1237 = vmatprep.subr.bf16.mxu1 %v1446_v0 }
 0x9b5   :  { %1239 = vmatpush3.bf16.msra.mxu1 %v1540_v12 }
 0xa83   :  { %v653_v35 = vpop.f32.mrb[4].mxu1 }
 0xa84   :  { %v657_v36 = vadd.f32 %v653_v35, %v581_v34  ;;  %v1161_v37 = vpop.f32.mrb[5].mxu1 }
 0xa86   :  { %v1050_v38 = vmul.f32 -1.442695, %v657_v36  ;;  %1291 = vtanh.f32 %v657_v36 }
 0xa88   :  { %1293 = vpow2.f32 %v1050_v38 }
 0xa90   :  { %v1292_v39 = vpop.eup %1291 }
 0xa91   :  { %666 = vrot.lane.b32.xlu1 %v1292_v39, %s1450_s6 }
 0xa92   :  { %v1294_v40 = vpop.eup %1293 }
 0xa93   :  { %v661_v41 = vadd.f32 1.0, %v1294_v40 }
 0xa95   :  { %1295 = vrcp.f32 %v661_v41 }
 0xa9f   :  { %v1296_v42 = vpop.eup %1295 }
 0xaa0   :  { %v674_v44 = vmul.f32 %v1296_v42, %v672_v43 }
 0xaa2   :  { %676 = vrot.lane.b32.xlu0 %v674_v44, %s1449_s2 }
 0xb03   :  { %v667_v45 = vpop.permute.xlu1 %666 }
 0xb04   :  { %v669_v46 = vmul.f32 %v1296_v42, %v667_v45 }
 0xb14   :  { %v677_v47 = vpop.permute.xlu0 %676 }
 0xb15   :  { %v679_v48 = vadd.f32 %v677_v47, %v669_v46 }
 0xb17   :  { %1297 = vtanh.f32 %v679_v48 }
 0xb21   :  { %v1298_v49 = vpop.eup %1297 }
 0xb22   :  { %682 = vrot.lane.b32.xlu1 %v1298_v49, %s1450_s6 }
 0xb26   :  { %776 = vrot.lane.b32.xlu1 %v679_v48, %s1449_s2 }
 0xb94   :  { %v683_v50 = vpop.permute.xlu1 %682 }
 0xb95   :  { %v685_v51 = vmul.f32 %v1296_v42, %v683_v50 }
 0xb97   :  { %688 = vrot.lane.b32.xlu0 %v685_v51, %s1451_s3 }
 0xb98   :  { %v777_v61 = vpop.permute.xlu1 %776 }
 0xc09   :  { %v689_v52 = vpop.permute.xlu0 %688 }
 0xc0a   :  { %1171 = vmatmul.mubr.msk.f32.vlgmr.msra.gmra.mrb[6].mxu0 %vm159_vm3, %v689_v52 }
 0xc0b   :  { %1242 = vmatpush3.bf16.msra.mxu0 %v1536_v8  ;;  %1192 = vmatprep.mubr.msk.f32.mxu0 %vm1447_vm0, %v1448_v1 }
 0xc0c   :  { %1243 = vmatprep.subr.bf16.mxu0 %v1446_v0 }
 0xc0f   :  { %1245 = vmatpush3.bf16.msra.mxu0 %v1540_v12 }
 0xcdd   :  { %v758_v54 = vpop.f32.mrb[6].mxu0 }
 0xcde   :  { %v762_v55 = vadd.f32 %v758_v54, %v686_v53  ;;  %v1172_v56 = vpop.f32.mrb[7].mxu0 }
 0xce0   :  { %v1052_v57 = vmul.f32 -1.442695, %v762_v55  ;;  %1299 = vtanh.f32 %v762_v55 }
 0xce2   :  { %1301 = vpow2.f32 %v1052_v57 }
 0xcea   :  { %v1300_v58 = vpop.eup %1299 }
 0xceb   :  { %771 = vrot.lane.b32.xlu0 %v1300_v58, %s1450_s6 }
 0xcec   :  { %v1302_v59 = vpop.eup %1301 }
 0xced   :  { %v766_v60 = vadd.f32 1.0, %v1302_v59 }
 0xcef   :  { %1303 = vrcp.f32 %v766_v60 }
 0xcf9   :  { %v1304_v8 = vpop.eup %1303 }
 0xcfa   :  { %v779_v1 = vmul.f32 %v1304_v8, %v777_v61 }
 0xcfc   :  { %781 = vrot.lane.b32.xlu1 %v779_v1, %s1449_s2 }
 0xd5d   :  { %v772_v0 = vpop.permute.xlu0 %771 }
 0xd5e   :  { %v774_v12 = vmul.f32 %v1304_v8, %v772_v0 }
 0xd6e   :  { %v782_v62 = vpop.permute.xlu1 %781 }
 0xd6f   :  { %v784_v63 = vadd.f32 %v782_v62, %v774_v12 }
 0xd71   :  { %1305 = vtanh.f32 %v784_v63 }
 0xd7b   :  { %v1306_v2 = vpop.eup %1305 }
 0xd7c   :  { %787 = vrot.lane.b32.xlu0 %v1306_v2, %s1450_s6 }
 0xd80   :  { %881 = vrot.lane.b32.xlu0 %v784_v63, %s1449_s2 }
 0xdee   :  { %v788_v3 = vpop.permute.xlu0 %787 }
 0xdef   :  { %v790_v4 = vmul.f32 %v1304_v8, %v788_v3 }
 0xdf1   :  { %793 = vrot.lane.b32.xlu1 %v790_v4, %s1451_s3 }
 0xdf2   :  { %v882_v17 = vpop.permute.xlu0 %881 }
 0xe63   :  { %v794_v5 = vpop.permute.xlu1 %793 }
 0xe64   :  { %1182 = vmatmul.mubr.msk.f32.vlgmr.msra.gmra.mrb[6].mxu1 %vm159_vm3, %v794_v5 }
 0xf37   :  { %v863_v7 = vpop.f32.mrb[6].mxu1 }
 0xf38   :  { %v867_v9 = vadd.f32 %v863_v7, %v791_v6  ;;  %v1183_v10 = vpop.f32.mrb[7].mxu1 }
 0xf3a   :  { %v1054_v11 = vmul.f32 -1.442695, %v867_v9  ;;  %1307 = vtanh.f32 %v867_v9 }
 0xf3c   :  { %1309 = vpow2.f32 %v1054_v11 }
 0xf44   :  { %v1308_v13 = vpop.eup %1307 }
 0xf45   :  { %876 = vrot.lane.b32.xlu1 %v1308_v13, %s1450_s6 }
 0xf46   :  { %v1310_v14 = vpop.eup %1309 }
 0xf47   :  { %v871_v15 = vadd.f32 1.0, %v1310_v14 }
 0xf49   :  { %1311 = vrcp.f32 %v871_v15 }
 0xf53   :  { %v1312_v16 = vpop.eup %1311 }
 0xf54   :  { %v884_v18 = vmul.f32 %v1312_v16, %v882_v17 }
 0xf56   :  { %886 = vrot.lane.b32.xlu0 %v884_v18, %s1449_s2 }
 0xfb7   :  { %v877_v19 = vpop.permute.xlu1 %876 }
 0xfb8   :  { %v879_v20 = vmul.f32 %v1312_v16, %v877_v19 }
 0xfc8   :  { %v887_v21 = vpop.permute.xlu0 %886 }
 0xfc9   :  { %v889_v22 = vadd.f32 %v887_v21, %v879_v20 }
 0xfcb   :  { %1313 = vtanh.f32 %v889_v22 }
 0xfd5   :  { %v1314_v23 = vpop.eup %1313 }
 0xfd6   :  { %892 = vrot.lane.b32.xlu1 %v1314_v23, %s1450_s6 }
 0xfda   :  { %986 = vrot.lane.b32.xlu1 %v889_v22, %s1449_s2 }
0x1048   :  { %v893_v24 = vpop.permute.xlu1 %892 }
0x1049   :  { %v895_v25 = vmul.f32 %v1312_v16, %v893_v24 }
0x104b   :  { %898 = vrot.lane.b32.xlu0 %v895_v25, %s1451_s3 }
0x104c   :  { %v987_v36 = vpop.permute.xlu1 %986 }
0x10bd   :  { %v899_v26 = vpop.permute.xlu0 %898 }
0x10be   :  { %1193 = vmatmul.mubr.msk.f32.vlgmr.msra.gmra.mrb[8].mxu0 %vm159_vm3, %v899_v26 }
0x1191   :  { %v968_v28 = vpop.f32.mrb[8].mxu0 }
0x1192   :  { %v972_v29 = vadd.f32 %v968_v28, %v896_v27  ;;  %v1194_v30 = vpop.f32.mrb[9].mxu0 }
0x1194   :  { %v1056_v31 = vmul.f32 -1.442695, %v972_v29  ;;  %1315 = vtanh.f32 %v972_v29 }
0x1196   :  { %1317 = vpow2.f32 %v1056_v31 }
0x119e   :  { %v1316_v32 = vpop.eup %1315 }
0x119f   :  { %981 = vrot.lane.b32.xlu0 %v1316_v32, %s1450_s6 }
0x11a0   :  { %v1318_v33 = vpop.eup %1317 }
0x11a1   :  { %v976_v34 = vadd.f32 1.0, %v1318_v33 }
0x11a3   :  { %1319 = vrcp.f32 %v976_v34 }
0x11ad   :  { %v1320_v35 = vpop.eup %1319 }
0x11ae   :  { %v989_v37 = vmul.f32 %v1320_v35, %v987_v36 }
0x11b0   :  { %991 = vrot.lane.b32.xlu1 %v989_v37, %s1449_s2 }
0x1211   :  { %v982_v38 = vpop.permute.xlu0 %981 }
0x1212   :  { %v984_v39 = vmul.f32 %v1320_v35, %v982_v38 }
0x1222   :  { %v992_v40 = vpop.permute.xlu1 %991 }
0x1223   :  { %v994_v41 = vadd.f32 %v992_v40, %v984_v39 }
0x1225   :  { %1321 = vtanh.f32 %v994_v41  ;;  %1002 = vst.msk [vmem:[#allocation9] sm:$0x1] %vm64_vm1, %v994_v41 }
0x122f   :  { %v1322_v42 = vpop.eup %1321 }
0x1230   :  { %997 = vrot.lane.b32.xlu0 %v1322_v42, %s1450_s6 }
0x1231   :  { %1400 = shalt.err (!%p1397_p0)
}
0x1232   :  { %s1401_s13 = scalar_lea.hbm %s1666_s4, 16 }
0x1233   :  { %p1402_p1 = scmp.ne.s32.totalorder %s1666_s4, %s1401_s13  ;;  %p1405_p2 = scmp.lt.u32.totalorder %s1401_s13, %s1666_s4 }
0x1235   :  { %p1407_p3 = pnand %p1405_p2, %p1402_p1 }
0x1237   :  { %1410 = shalt.err (!%p1407_p3)
}
0x1238   :  { %1017 = dma.vmem_to_hbm [thread:$0]  %s1015_s8, 16, %s1666_s4, [#allocation5]  }
0x1239   :  { %s1453_s19 = smov [#allocation10]  }
0x123a   :  { %s1024_s20 = sshll.u32 %s1453_s19, 4  ;;  %s1025_s20 = int_to_ptr.vmem [resolvable:$true] %s1024_s20 }
0x123b   :  { %s1411_s21 = scalar_lea.vmem %s1025_s20, 16  ;;  %s1415_s22 = scalar_lea.vmem %s1025_s20, 32 }
0x123c   :  { %p1412_p4 = scmp.ne.s32.totalorder %s1025_s20, %s1411_s21  ;;  %p1416_p5 = scmp.lt.s32.totalorder %s1025_s20, %s1025_s20 }
0x123d   :  { %p1417_p6 = scmp.lt.s32.totalorder %s1415_s22, %s1411_s21 }
0x123f   :  { %p1418_p7 = por %p1417_p6, %p1416_p5 }
0x1241   :  { %p1419_p8 = pnand %p1418_p7, %p1412_p4 }
0x12a2   :  { %v998_v43 = vpop.permute.xlu0 %997 }
0x12a3   :  { %v1000_v44 = vmul.f32 %v1320_v35, %v998_v43 }
0x12a5   :  { %1004 = vrot.lane.b32.xlu1 %v1000_v44, %s1451_s3 }
0x1317   :  { %v1005_v45 = vpop.permute.xlu1 %1004 }
0x1318   :  { %1007 = vst.msk [vmem:[#allocation10] sm:$0x1] %vm64_vm1, %v1005_v45 }
0x1319   :  { %1422 = shalt.err (!%p1419_p8)
}
0x131a   :  { %s1423_s24 = scalar_lea.hbm %s1667_s5, 16 }
0x131b   :  { %p1424_p9 = scmp.ne.s32.totalorder %s1667_s5, %s1423_s24  ;;  %p1427_p10 = scmp.lt.u32.totalorder %s1423_s24, %s1667_s5 }
0x131d   :  { %p1429_p11 = pnand %p1427_p10, %p1424_p9 }
0x131f   :  { %1432 = shalt.err (!%p1429_p11)
}
0x1320   :  { %1027 = dma.vmem_to_hbm [thread:$0]  %s1025_s20, 16, %s1667_s5, [#allocation11]  }
0x1321   :  { %1437 = dma.done.wait [#allocation5], 16  }
0x1322   :  { %1438 = vsyncadd [#allocation5], 4294967280 }
0x1323   :  { %1439 = dma.done.wait [#allocation11], 16  }
0x1324   :  { %1440 = vsyncadd [#allocation11], 4294967280 }
0x1325   :  { %1034 = vsyncpa [#allocation4], 1 }
0x1326   :  { %1035 = vsyncpa [#allocation7], 1 }
0x1327   :  { %1036 = vsyncpa [#allocation5], 1 }
0x1328   :  { %1037 = vsyncpa [#allocation11], 1 }

</bundles_post_ra>
